<compile_context>
chip_gen: v7x
topology: tpu7x:2x2x1
jax: 0.10.0
libtpu: 0.0.40
codegen_flags: <defaults>
</compile_context>

<pallas_src>
import jax
import jax.numpy as jnp
from jax.experimental import pallas as pl
from jax.experimental.pallas import tpu as pltpu


def electra_head_kernel(cls_ref, w_ref, b_ref, o_ref):
    # cls_ref: [4, Bt, H]   CLS token from hidden_states[-1], [-2], [-3], [-4]
    # w_ref:   [4, H, Lp]   classifier weight split per hidden-state chunk
    # b_ref:   [1, Lp]      classifier bias (lane-padded)
    # o_ref:   [Bt, Lp]     logits (lane-padded)
    #
    # Equivalent to concat(cls_0..cls_3, axis=-1) @ W + b, but without ever
    # materializing the [Bt, 4H] concat: four dots into one f32 accumulator.
    acc = jnp.dot(cls_ref[0], w_ref[0], preferred_element_type=jnp.float32)
    for k in range(1, cls_ref.shape[0]):
        acc = acc + jnp.dot(cls_ref[k], w_ref[k],
                            preferred_element_type=jnp.float32)
    o_ref[...] = (acc + b_ref[...]).astype(o_ref.dtype)


def electra_head_forward(cls_stack, w, b):
    """cls_stack: [4, B, H] (CLS of last 4 hidden states, order -1,-2,-3,-4),
    w: [4H, L] (in x out), b: [L]  ->  logits [B, L] f32."""
    K, B, H = cls_stack.shape
    L = w.shape[-1]
    assert w.shape == (K * H, L) and b.shape == (L,)

    # Lane-dense output: pad num_labels up to a multiple of 128.
    Lp = max(128, ((L + 127) // 128) * 128)
    # Adaptive batch tile: sublane-aligned, up to 128 rows; single grid step
    # for small batches.
    bt = min(128, ((B + 7) // 8) * 8)
    Bp = ((B + bt - 1) // bt) * bt

    cls_p = jnp.pad(cls_stack, ((0, 0), (0, Bp - B), (0, 0)))
    w4 = w.reshape(K, H, L)                                   # rows k*H:(k+1)*H
    w_p = jnp.pad(w4, ((0, 0), (0, 0), (0, Lp - L)))
    b_p = jnp.pad(b, (0, Lp - L)).reshape(1, Lp)

    in_bytes = jnp.dtype(cls_stack.dtype).itemsize
    cost = pl.CostEstimate(
        flops=2 * Bp * K * H * Lp,
        transcendentals=0,
        bytes_accessed=(cls_p.size * in_bytes + w_p.size * 4
                        + b_p.size * 4 + Bp * Lp * 4),
    )

    out = pl.pallas_call(
        electra_head_kernel,
        out_shape=jax.ShapeDtypeStruct((Bp, Lp), jnp.float32),
        grid_spec=pltpu.PrefetchScalarGridSpec(
            num_scalar_prefetch=0,
            grid=(Bp // bt,),
            in_specs=[
                pl.BlockSpec((K, bt, H), lambda i: (0, i, 0)),   # CLS tile
                pl.BlockSpec((K, H, Lp), lambda i: (0, 0, 0)),   # weight (VMEM-resident)
                pl.BlockSpec((1, Lp), lambda i: (0, 0)),         # bias (VMEM-resident)
            ],
            out_specs=pl.BlockSpec((bt, Lp), lambda i: (i, 0)),
        ),
        compiler_params=pltpu.CompilerParams(
            dimension_semantics=("parallel",)),
        cost_estimate=cost,
    )(cls_p, w_p, b_p)
    return out[:B, :L]


if __name__ == "__main__":
    # Small, forward-consistent shapes.
    B, S, H = 2, 8, 32          # batch, seq, hidden_size
    L = 8                       # num_labels
    VOCAB = 100
    NL = 6                      # stand-in backbone depth

    key = jax.random.PRNGKey(0)
    k_ids, k_emb, k_layers, k_w, k_b = jax.random.split(key, 5)

    # Inputs matching the module signature.
    input_ids = jax.random.randint(k_ids, (B, S), 0, VOCAB, dtype=jnp.int32)
    attention_mask = jnp.ones((B, S), dtype=jnp.int32)

    # TODO(synk): pretrained ELECTRA backbone (model.from_pretrained) is not
    # reproducible here; stand-in embedding + tanh layers emit hidden_states.
    emb_table = jax.random.normal(k_emb, (VOCAB, H), dtype=jnp.float32) * 0.02
    layer_keys = jax.random.split(k_layers, NL)
    layer_ws = [jax.random.normal(k, (H, H), dtype=jnp.float32) / jnp.sqrt(H)
                for k in layer_keys]

    h = emb_table[input_ids] * attention_mask[:, :, None].astype(jnp.float32)
    hidden_states = [h]                         # mirrors outputs[1] tuple
    for l in range(NL):
        h = jnp.tanh(h @ layer_ws[l])
        hidden_states.append(h)

    # CLS (seq position 0) from the last four hidden states, reference order.
    cls_list = [hidden_states[-1][:, 0, :], hidden_states[-2][:, 0, :],
                hidden_states[-3][:, 0, :], hidden_states[-4][:, 0, :]]
    cls_stack = jnp.stack(cls_list, axis=0)     # [4, B, H]

    # Classifier parameters (nn.Linear(4H, L)), deterministic init (in x out).
    w = jax.random.normal(k_w, (4 * H, L), dtype=jnp.float32) * 0.02
    b = jax.random.normal(k_b, (L,), dtype=jnp.float32) * 0.02

    head = jax.jit(electra_head_forward)
    logits = head(cls_stack, w, b)
    jax.block_until_ready(logits)

    # Reference check in plain JAX (explicit concat + matmul + bias).
    cls_cat = jnp.concatenate(cls_list, axis=-1)         # [B, 4H]
    ref = cls_cat @ w + b
    assert logits.shape == (B, L)
    assert jnp.allclose(logits, ref, atol=2e-3, rtol=2e-3), "mismatch vs reference"

    print("KERNEL_OK")
</pallas_src>

<mosaic_0001>
module attributes {stable_mosaic.version = 11 : i64} {
  func.func @electra_head_kernel(%arg0: i32, %arg1: memref<4x8x32xf32, #tpu.memory_space<vmem>>, %arg2: memref<4x32x128xf32, #tpu.memory_space<vmem>>, %arg3: memref<1x128xf32, #tpu.memory_space<vmem>>, %arg4: memref<8x128xf32, #tpu.memory_space<vmem>>) attributes {dimension_semantics = [#tpu.dimension_semantics<parallel>], iteration_bounds = array<i64: 1>, scalar_prefetch = 0 : i64, scratch_operands = 0 : i64, tpu.core_type = #tpu.core_type<tc>, window_params = [{transform_indices = @transform_0, window_bounds = array<i64: 4, 8, 32>}, {pipeline_mode = #tpu.pipeline_mode<synchronous>, transform_indices = @transform_1, window_bounds = array<i64: 4, 32, 128>}, {pipeline_mode = #tpu.pipeline_mode<synchronous>, transform_indices = @transform_2, window_bounds = array<i64: 1, 128>}, {transform_indices = @transform_3, window_bounds = array<i64: 8, 128>}]} {
    %c0 = arith.constant 0 : index
    %c0_0 = arith.constant 0 : index
    %c0_1 = arith.constant 0 : index
    %0 = vector.load %arg1[%c0, %c0_0, %c0_1] : memref<4x8x32xf32, #tpu.memory_space<vmem>>, vector<1x8x32xf32>
    %1 = vector.shape_cast %0 : vector<1x8x32xf32> to vector<8x32xf32>
    %c0_2 = arith.constant 0 : index
    %c0_3 = arith.constant 0 : index
    %c0_4 = arith.constant 0 : index
    %2 = vector.load %arg2[%c0_2, %c0_3, %c0_4] : memref<4x32x128xf32, #tpu.memory_space<vmem>>, vector<1x32x128xf32>
    %3 = vector.shape_cast %2 : vector<1x32x128xf32> to vector<32x128xf32>
    %cst = arith.constant dense<0.000000e+00> : vector<8x128xf32>
    %4 = tpu.matmul %1, %3, %cst {dimension_numbers = #tpu.dot_dimension_numbers<[1], [0], [0], [1], [0, 0, 1, 1], [], []>} : vector<8x32xf32>, vector<32x128xf32>, vector<8x128xf32> -> vector<8x128xf32>
    %c1 = arith.constant 1 : index
    %c0_5 = arith.constant 0 : index
    %c0_6 = arith.constant 0 : index
    %5 = vector.load %arg1[%c1, %c0_5, %c0_6] : memref<4x8x32xf32, #tpu.memory_space<vmem>>, vector<1x8x32xf32>
    %6 = vector.shape_cast %5 : vector<1x8x32xf32> to vector<8x32xf32>
    %c1_7 = arith.constant 1 : index
    %c0_8 = arith.constant 0 : index
    %c0_9 = arith.constant 0 : index
    %7 = vector.load %arg2[%c1_7, %c0_8, %c0_9] : memref<4x32x128xf32, #tpu.memory_space<vmem>>, vector<1x32x128xf32>
    %8 = vector.shape_cast %7 : vector<1x32x128xf32> to vector<32x128xf32>
    %cst_10 = arith.constant dense<0.000000e+00> : vector<8x128xf32>
    %9 = tpu.matmul %6, %8, %cst_10 {dimension_numbers = #tpu.dot_dimension_numbers<[1], [0], [0], [1], [0, 0, 1, 1], [], []>} : vector<8x32xf32>, vector<32x128xf32>, vector<8x128xf32> -> vector<8x128xf32>
    %10 = arith.addf %4, %9 : vector<8x128xf32>
    %c2 = arith.constant 2 : index
    %c0_11 = arith.constant 0 : index
    %c0_12 = arith.constant 0 : index
    %11 = vector.load %arg1[%c2, %c0_11, %c0_12] : memref<4x8x32xf32, #tpu.memory_space<vmem>>, vector<1x8x32xf32>
    %12 = vector.shape_cast %11 : vector<1x8x32xf32> to vector<8x32xf32>
    %c2_13 = arith.constant 2 : index
    %c0_14 = arith.constant 0 : index
    %c0_15 = arith.constant 0 : index
    %13 = vector.load %arg2[%c2_13, %c0_14, %c0_15] : memref<4x32x128xf32, #tpu.memory_space<vmem>>, vector<1x32x128xf32>
    %14 = vector.shape_cast %13 : vector<1x32x128xf32> to vector<32x128xf32>
    %cst_16 = arith.constant dense<0.000000e+00> : vector<8x128xf32>
    %15 = tpu.matmul %12, %14, %cst_16 {dimension_numbers = #tpu.dot_dimension_numbers<[1], [0], [0], [1], [0, 0, 1, 1], [], []>} : vector<8x32xf32>, vector<32x128xf32>, vector<8x128xf32> -> vector<8x128xf32>
    %16 = arith.addf %10, %15 : vector<8x128xf32>
    %c3 = arith.constant 3 : index
    %c0_17 = arith.constant 0 : index
    %c0_18 = arith.constant 0 : index
    %17 = vector.load %arg1[%c3, %c0_17, %c0_18] : memref<4x8x32xf32, #tpu.memory_space<vmem>>, vector<1x8x32xf32>
    %18 = vector.shape_cast %17 : vector<1x8x32xf32> to vector<8x32xf32>
    %c3_19 = arith.constant 3 : index
    %c0_20 = arith.constant 0 : index
    %c0_21 = arith.constant 0 : index
    %19 = vector.load %arg2[%c3_19, %c0_20, %c0_21] : memref<4x32x128xf32, #tpu.memory_space<vmem>>, vector<1x32x128xf32>
    %20 = vector.shape_cast %19 : vector<1x32x128xf32> to vector<32x128xf32>
    %cst_22 = arith.constant dense<0.000000e+00> : vector<8x128xf32>
    %21 = tpu.matmul %18, %20, %cst_22 {dimension_numbers = #tpu.dot_dimension_numbers<[1], [0], [0], [1], [0, 0, 1, 1], [], []>} : vector<8x32xf32>, vector<32x128xf32>, vector<8x128xf32> -> vector<8x128xf32>
    %22 = arith.addf %16, %21 : vector<8x128xf32>
    %c0_23 = arith.constant 0 : index
    %c0_24 = arith.constant 0 : index
    %23 = vector.load %arg3[%c0_23, %c0_24] : memref<1x128xf32, #tpu.memory_space<vmem>>, vector<1x128xf32>
    %24 = vector.broadcast %23 : vector<1x128xf32> to vector<8x128xf32>
    %25 = arith.addf %22, %24 : vector<8x128xf32>
    %c0_25 = arith.constant 0 : index
    %c0_26 = arith.constant 0 : index
    %26 = vector.load %arg4[%c0_25, %c0_26] : memref<8x128xf32, #tpu.memory_space<vmem>>, vector<8x128xf32>
    tpu.vector_store %arg4[%c0_25, %c0_26], %25 {strides = array<i32>} : memref<8x128xf32, #tpu.memory_space<vmem>>, vector<8x128xf32>,
    return
  }
  func.func @transform_0(%arg0: i32) -> (i32, i32, i32) {
    %c0_i32 = arith.constant 0 : i32
    %c0_i32_0 = arith.constant 0 : i32
    %c0_i32_1 = arith.constant 0 : i32
    return %c0_i32, %arg0, %c0_i32_0 : i32, i32, i32
  }
  func.func @transform_1(%arg0: i32) -> (i32, i32, i32) {
    %c0_i32 = arith.constant 0 : i32
    %c0_i32_0 = arith.constant 0 : i32
    %c0_i32_1 = arith.constant 0 : i32
    %c0_i32_2 = arith.constant 0 : i32
    return %c0_i32, %c0_i32_0, %c0_i32_1 : i32, i32, i32
  }
  func.func @transform_2(%arg0: i32) -> (i32, i32) {
    %c0_i32 = arith.constant 0 : i32
    %c0_i32_0 = arith.constant 0 : i32
    %c0_i32_1 = arith.constant 0 : i32
    return %c0_i32, %c0_i32_0 : i32, i32
  }
  func.func @transform_3(%arg0: i32) -> (i32, i32) {
    %c0_i32 = arith.constant 0 : i32
    %c0_i32_0 = arith.constant 0 : i32
    return %arg0, %c0_i32 : i32, i32
  }
}

</mosaic_0001>

<bundles_post_ra>
// kernel: electra_head_forward.1
= control target key start
LH: loop header
LB: loop body
LE: loop exit
PB: predicated region body
PF: predicated region fallthrough
CT: control target
= control target key end

     0   :  { %v459_v0 = vmov 0.0|0.0   ;;  %vm460_vm0 = vmmov 0   ;;  %v461_v8 = vmov 0.0   ;;  %vm26_vm1 = vcmask 261120   ;;  %s556_s1 = inlined_call_operand.vmem [shape: f32[4,32,128], index: 1, kind: input, shape index: {}]   ;;  %s557_s0 = inlined_call_operand.vmem [shape: f32[4,8,32], index: 0, kind: input, shape index: {}]   ;;  %s558_s2 = inlined_call_operand.vmem [shape: f32[1,128], index: 2, kind: input, shape index: {}]   ;;  %s559_s3 = inlined_call_operand.vmem [shape: f32[8,128], index: 3, kind: output, shape index: {}]  }
   0x1   :  { %432 = vmatprep.subr.bf16.mxu0 %v459_v0  ;;  %v349_v1 = vld [vmem:[%s556_s1 + $0x20] sm:$0xff]  ;;  %v350_v2 = vld [vmem:[%s556_s1 + $0x28] sm:$0xff]  ;;  %438 = vmatprep.subr.bf16.mxu1 %v459_v0  ;;  %v351_v6 = vld [vmem:[%s556_s1 + $0x30] sm:$0xff] }
   0x2   :  { %v15_v3 = vld [vmem:[%s556_s1] sm:$0xff]  ;;  %v433_v4 = vpack.c.bf16 %v350_v2, %v349_v1  ;;  %v16_v5 = vld [vmem:[%s556_s1 + $0x8] sm:$0xff]  ;;  %v352_v7 = vld [vmem:[%s556_s1 + $0x38] sm:$0xff]  ;;  %396 = vmatprep.mubr.msk.f32.mxu0 %vm460_vm0, %v461_v8  ;;  %407 = vmatprep.mubr.msk.f32.mxu1 %vm460_vm0, %v461_v8 }
   0x3   :  { %v439_v9 = vpack.c.bf16 %v16_v5, %v15_v3  ;;  %v17_v10 = vld [vmem:[%s556_s1 + $0x10] sm:$0xff]  ;;  %v18_v11 = vld [vmem:[%s556_s1 + $0x18] sm:$0xff]  ;;  %v436_v12 = vpack.c.bf16 %v352_v7, %v351_v6  ;;  %v356_v14 = vld [vmem:[%s556_s1 + $0x40] sm:$0xff] }
   0x4   :  { %434 = vmatpush3.bf16.msra.mxu0 %v433_v4  ;;  %v442_v13 = vpack.c.bf16 %v18_v11, %v17_v10  ;;  %v357_v15 = vld [vmem:[%s556_s1 + $0x48] sm:$0xff]  ;;  %v362_v16 = vld [vmem:[%s556_s1 + $0x60] sm:$0xff]  ;;  %v358_v22 = vld [vmem:[%s556_s1 + $0x50] sm:$0xff] }
   0x5   :  { %440 = vmatpush3.bf16.msra.mxu1 %v439_v9  ;;  %435 = vmatprep.subr.bf16.mxu0 %v459_v0  ;;  %v363_v17 = vld [vmem:[%s556_s1 + $0x68] sm:$0xff]  ;;  %v445_v19 = vpack.c.bf16 %v357_v15, %v356_v14  ;;  %v14_v20 = vld [vmem:[%s557_s0] sm:$0xff]  ;;  %v359_v23 = vld [vmem:[%s556_s1 + $0x58] sm:$0xff] }
   0x6   :  { %441 = vmatprep.subr.bf16.mxu1 %v459_v0  ;;  %v348_v18 = vld [vmem:[%s557_s0 + $0x8] sm:$0xff]  ;;  %v451_v21 = vpack.c.bf16 %v363_v17, %v362_v16  ;;  %v364_v24 = vld [vmem:[%s556_s1 + $0x70] sm:$0xff]  ;;  %v365_v25 = vld [vmem:[%s556_s1 + $0x78] sm:$0xff]  ;;  %v448_v26 = vpack.c.bf16 %v359_v23, %v358_v22 }
   0x7   :  { %v454_v27 = vpack.c.bf16 %v365_v25, %v364_v24  ;;  %v355_v28 = vld [vmem:[%s557_s0 + $0x10] sm:$0xff]  ;;  %v361_v29 = vld [vmem:[%s557_s0 + $0x18] sm:$0xff]  ;;  %v367_v39 = vld [vmem:[%s558_s2] ss:$0 sm:$0xff] }
   0x8   :  { %437 = vmatpush3.bf16.msra.mxu0 %v436_v12 }
   0x9   :  { %443 = vmatpush3.bf16.msra.mxu1 %v442_v13  ;;  %444 = vmatprep.subr.bf16.mxu0 %v459_v0 }
   0xa   :  { %450 = vmatprep.subr.bf16.mxu1 %v459_v0 }
   0xb   :  { %397 = vmatmul.mubr.msk.f32.vlgmr.msra.gmra.mrb[0].mxu0 %vm26_vm1, %v348_v18 }
   0xc   :  { %408 = vmatmul.mubr.msk.f32.vlgmr.msra.gmra.mrb[0].mxu1 %vm26_vm1, %v14_v20  ;;  %446 = vmatpush3.bf16.msra.mxu0 %v445_v19 }
   0xd   :  { %452 = vmatpush3.bf16.msra.mxu1 %v451_v21  ;;  %447 = vmatprep.subr.bf16.mxu0 %v459_v0 }
   0xe   :  { %453 = vmatprep.subr.bf16.mxu1 %v459_v0  ;;  %418 = vmatprep.mubr.msk.f32.mxu0 %vm460_vm0, %v461_v8 }
   0xf   :  { %429 = vmatprep.mubr.msk.f32.mxu1 %vm460_vm0, %v461_v8 }
  0x10   :  { %449 = vmatpush3.bf16.msra.mxu0 %v448_v26 }
  0x11   :  { %455 = vmatpush3.bf16.msra.mxu1 %v454_v27 }
  0x13   :  { %419 = vmatmul.mubr.msk.f32.vlgmr.msra.gmra.mrb[2].mxu0 %vm26_vm1, %v355_v28 }
  0x14   :  { %430 = vmatmul.mubr.msk.f32.vlgmr.msra.gmra.mrb[2].mxu1 %vm26_vm1, %v361_v29 }
  0xde   :  { %v96_v30 = vpop.f32.mrb[0].mxu0 }
  0xdf   :  { %v398_v31 = vpop.f32.mrb[1].mxu0  ;;  %v169_v32 = vpop.f32.mrb[0].mxu1 }
  0xe0   :  { %v170_v33 = vadd.f32 %v169_v32, %v96_v30  ;;  %v409_v34 = vpop.f32.mrb[1].mxu1 }
  0xe6   :  { %v249_v35 = vpop.f32.mrb[2].mxu0 }
  0xe7   :  { %v253_v36 = vadd.f32 %v249_v35, %v170_v33  ;;  %v420_v37 = vpop.f32.mrb[3].mxu0  ;;  %v330_v38 = vpop.f32.mrb[2].mxu1 }
  0xe8   :  { %v431_v40 = vpop.f32.mrb[3].mxu1 }
  0xe9   :  { %v334_v41 = vadd.f32 %v330_v38, %v253_v36 }
  0xeb   :  { %v342_v42 = vadd.f32 %v367_v39, %v334_v41 }
  0xed   :  { %343 = vst [vmem:[%s559_s3] sm:$0xff] %v342_v42 }

</bundles_post_ra>
